<compile_context>
chip_gen: v7x
topology: tpu7x:2x2x1
jax: 0.10.0
libtpu: 0.0.40
codegen_flags: <defaults>
</compile_context>

<pallas_src>
import jax
import jax.numpy as jnp
from jax.experimental import pallas as pl
from jax.experimental.pallas import tpu as pltpu
import numpy as np


def text_sentiment_kernel(text_ref, w_eff_ref, b_ref, out_ref):
    """text_ref:  (B_pad, L)      int32   token ids
       w_eff_ref: (V, C_pad)      float32 fused emb @ fc_w.T (lane-padded)
       b_ref:     (1, C_pad)      float32 lane-padded bias
       out_ref:   (B_pad, C_pad)  float32 lane-dense logits slab
    """
    Bp, L = text_ref.shape
    V = w_eff_ref.shape[0]

    text = text_ref[...]                                          # (Bp, L) int32
    iota_v = jax.lax.broadcasted_iota(jnp.int32, (Bp, V), 1)      # (Bp, V)

    # Bag counts accumulated on a (Bp, V) tile — no (B, L, V) intermediate.
    # L is small and static, so a Python unroll is fine (VPU compares only).
    bag = jnp.zeros((Bp, V), dtype=jnp.float32)
    for l in range(L):
        bag = bag + (text[:, l:l + 1] == iota_v).astype(jnp.float32)
    bag = bag * (1.0 / L)                                         # mean pooling

    # Single fused MXU op: logits = bag @ (emb @ W.T) + b, lane-dense output.
    out_ref[...] = (
        jnp.dot(bag, w_eff_ref[...], preferred_element_type=jnp.float32)
        + b_ref[...]
    )


def text_sentiment(text, emb, fc_w, fc_b):
    B, L = text.shape
    V, D = emb.shape
    C = fc_w.shape[0]

    LANE, SUBLANE = 128, 8
    C_pad = ((C + LANE - 1) // LANE) * LANE
    B_pad = ((B + SUBLANE - 1) // SUBLANE) * SUBLANE

    # Input-independent weight folding (done once; could be cached across calls):
    #   mean_l emb[text[b, l]] @ fc_w.T  ==  bag @ (emb @ fc_w.T)
    w_eff = jnp.dot(emb, fc_w.T, preferred_element_type=jnp.float32)   # (V, C)
    w_eff_p = jnp.zeros((V, C_pad), jnp.float32).at[:, :C].set(w_eff)
    b_p = jnp.zeros((1, C_pad), jnp.float32).at[:, :C].set(fc_b.reshape(1, C))

    # Sublane-pad the batch with dummy rows (token 0); sliced off below.
    text_p = jnp.zeros((B_pad, L), jnp.int32).at[:B, :].set(text)

    out_p = pl.pallas_call(
        text_sentiment_kernel,
        out_shape=jax.ShapeDtypeStruct((B_pad, C_pad), jnp.float32),
        in_specs=[
            pl.BlockSpec(memory_space=pltpu.MemorySpace.VMEM),
            pl.BlockSpec(memory_space=pltpu.MemorySpace.VMEM),
            pl.BlockSpec(memory_space=pltpu.MemorySpace.VMEM),
        ],
        out_specs=pl.BlockSpec(memory_space=pltpu.MemorySpace.VMEM),
    )(text_p, w_eff_p, b_p)

    return out_p[:B, :C]


if __name__ == "__main__":
    # Small shapes consistent with the module's forward pass.
    vocab_size = 32
    embed_dim = 32
    num_class = 4
    batch = 2
    seq_len = 8

    key = jax.random.PRNGKey(0)
    k_emb, k_w, k_text = jax.random.split(key, 3)

    # Deterministic init matching TextSentiment.init_weights():
    #   embedding.weight ~ U(-0.5, 0.5), fc.weight ~ U(-0.5, 0.5), fc.bias = 0
    initrange = 0.5
    emb = jax.random.uniform(k_emb, (vocab_size, embed_dim),
                             minval=-initrange, maxval=initrange,
                             dtype=jnp.float32)
    fc_w = jax.random.uniform(k_w, (num_class, embed_dim),
                              minval=-initrange, maxval=initrange,
                              dtype=jnp.float32)
    fc_b = jnp.zeros((num_class,), dtype=jnp.float32)

    text = jax.random.randint(k_text, (batch, seq_len), 0, vocab_size,
                              dtype=jnp.int32)

    out = text_sentiment(text, emb, fc_w, fc_b)
    out = jax.block_until_ready(out)

    # Pure-JAX reference: EmbeddingBag(mean) + Linear.
    ref_embedded = jnp.mean(emb[text], axis=1)            # (B, D)
    ref = ref_embedded @ fc_w.T + fc_b                    # (B, C)
    np.testing.assert_allclose(np.asarray(out), np.asarray(ref),
                               rtol=1e-5, atol=1e-5)

    print("KERNEL_OK")
</pallas_src>

<mosaic_0001>
module attributes {stable_mosaic.version = 11 : i64} {
  func.func @text_sentiment_kernel(%arg0: memref<8x8xi32, #tpu.memory_space<vmem>>, %arg1: memref<32x128xf32, #tpu.memory_space<vmem>>, %arg2: memref<1x128xf32, #tpu.memory_space<vmem>>, %arg3: memref<8x128xf32, #tpu.memory_space<vmem>>) attributes {dimension_semantics = [], scalar_prefetch = 0 : i64, scratch_operands = 0 : i64, tpu.core_type = #tpu.core_type<tc>} {
    %c0 = arith.constant 0 : index
    %c0_0 = arith.constant 0 : index
    %0 = vector.load %arg0[%c0, %c0_0] : memref<8x8xi32, #tpu.memory_space<vmem>>, vector<8x8xi32>
    %1 = tpu.iota {dimensions = array<i32: 1>} : vector<8x32xi32>
    %cst = arith.constant 0.000000e+00 : f32
    %2 = vector.broadcast %cst : f32 to vector<8x32xf32>
    %3 = vector.extract_strided_slice %0 {offsets = [0, 0], sizes = [8, 1], strides = [1, 1]} : vector<8x8xi32> to vector<8x1xi32>
    %4 = vector.broadcast %3 : vector<8x1xi32> to vector<8x32xi32>
    %5 = arith.cmpi eq, %4, %1 : vector<8x32xi32>
    %6 = arith.extui %5 : vector<8x32xi1> to vector<8x32xi32>
    %7 = arith.sitofp %6 : vector<8x32xi32> to vector<8x32xf32>
    %8 = arith.addf %2, %7 : vector<8x32xf32>
    %9 = vector.extract_strided_slice %0 {offsets = [0, 1], sizes = [8, 1], strides = [1, 1]} : vector<8x8xi32> to vector<8x1xi32>
    %10 = vector.broadcast %9 : vector<8x1xi32> to vector<8x32xi32>
    %11 = arith.cmpi eq, %10, %1 : vector<8x32xi32>
    %12 = arith.extui %11 : vector<8x32xi1> to vector<8x32xi32>
    %13 = arith.sitofp %12 : vector<8x32xi32> to vector<8x32xf32>
    %14 = arith.addf %8, %13 : vector<8x32xf32>
    %15 = vector.extract_strided_slice %0 {offsets = [0, 2], sizes = [8, 1], strides = [1, 1]} : vector<8x8xi32> to vector<8x1xi32>
    %16 = vector.broadcast %15 : vector<8x1xi32> to vector<8x32xi32>
    %17 = arith.cmpi eq, %16, %1 : vector<8x32xi32>
    %18 = arith.extui %17 : vector<8x32xi1> to vector<8x32xi32>
    %19 = arith.sitofp %18 : vector<8x32xi32> to vector<8x32xf32>
    %20 = arith.addf %14, %19 : vector<8x32xf32>
    %21 = vector.extract_strided_slice %0 {offsets = [0, 3], sizes = [8, 1], strides = [1, 1]} : vector<8x8xi32> to vector<8x1xi32>
    %22 = vector.broadcast %21 : vector<8x1xi32> to vector<8x32xi32>
    %23 = arith.cmpi eq, %22, %1 : vector<8x32xi32>
    %24 = arith.extui %23 : vector<8x32xi1> to vector<8x32xi32>
    %25 = arith.sitofp %24 : vector<8x32xi32> to vector<8x32xf32>
    %26 = arith.addf %20, %25 : vector<8x32xf32>
    %27 = vector.extract_strided_slice %0 {offsets = [0, 4], sizes = [8, 1], strides = [1, 1]} : vector<8x8xi32> to vector<8x1xi32>
    %28 = vector.broadcast %27 : vector<8x1xi32> to vector<8x32xi32>
    %29 = arith.cmpi eq, %28, %1 : vector<8x32xi32>
    %30 = arith.extui %29 : vector<8x32xi1> to vector<8x32xi32>
    %31 = arith.sitofp %30 : vector<8x32xi32> to vector<8x32xf32>
    %32 = arith.addf %26, %31 : vector<8x32xf32>
    %33 = vector.extract_strided_slice %0 {offsets = [0, 5], sizes = [8, 1], strides = [1, 1]} : vector<8x8xi32> to vector<8x1xi32>
    %34 = vector.broadcast %33 : vector<8x1xi32> to vector<8x32xi32>
    %35 = arith.cmpi eq, %34, %1 : vector<8x32xi32>
    %36 = arith.extui %35 : vector<8x32xi1> to vector<8x32xi32>
    %37 = arith.sitofp %36 : vector<8x32xi32> to vector<8x32xf32>
    %38 = arith.addf %32, %37 : vector<8x32xf32>
    %39 = vector.extract_strided_slice %0 {offsets = [0, 6], sizes = [8, 1], strides = [1, 1]} : vector<8x8xi32> to vector<8x1xi32>
    %40 = vector.broadcast %39 : vector<8x1xi32> to vector<8x32xi32>
    %41 = arith.cmpi eq, %40, %1 : vector<8x32xi32>
    %42 = arith.extui %41 : vector<8x32xi1> to vector<8x32xi32>
    %43 = arith.sitofp %42 : vector<8x32xi32> to vector<8x32xf32>
    %44 = arith.addf %38, %43 : vector<8x32xf32>
    %45 = vector.extract_strided_slice %0 {offsets = [0, 7], sizes = [8, 1], strides = [1, 1]} : vector<8x8xi32> to vector<8x1xi32>
    %46 = vector.broadcast %45 : vector<8x1xi32> to vector<8x32xi32>
    %47 = arith.cmpi eq, %46, %1 : vector<8x32xi32>
    %48 = arith.extui %47 : vector<8x32xi1> to vector<8x32xi32>
    %49 = arith.sitofp %48 : vector<8x32xi32> to vector<8x32xf32>
    %50 = arith.addf %44, %49 : vector<8x32xf32>
    %cst_1 = arith.constant 1.250000e-01 : f32
    %51 = vector.broadcast %cst_1 : f32 to vector<8x32xf32>
    %52 = arith.mulf %50, %51 : vector<8x32xf32>
    %c0_2 = arith.constant 0 : index
    %c0_3 = arith.constant 0 : index
    %53 = vector.load %arg1[%c0_2, %c0_3] : memref<32x128xf32, #tpu.memory_space<vmem>>, vector<32x128xf32>
    %cst_4 = arith.constant dense<0.000000e+00> : vector<8x128xf32>
    %54 = tpu.matmul %52, %53, %cst_4 {dimension_numbers = #tpu.dot_dimension_numbers<[1], [0], [0], [1], [0, 0, 1, 1], [], []>} : vector<8x32xf32>, vector<32x128xf32>, vector<8x128xf32> -> vector<8x128xf32>
    %c0_5 = arith.constant 0 : index
    %c0_6 = arith.constant 0 : index
    %55 = vector.load %arg2[%c0_5, %c0_6] : memref<1x128xf32, #tpu.memory_space<vmem>>, vector<1x128xf32>
    %56 = vector.broadcast %55 : vector<1x128xf32> to vector<8x128xf32>
    %57 = arith.addf %54, %56 : vector<8x128xf32>
    %c0_7 = arith.constant 0 : index
    %c0_8 = arith.constant 0 : index
    %58 = vector.load %arg3[%c0_7, %c0_8] : memref<8x128xf32, #tpu.memory_space<vmem>>, vector<8x128xf32>
    tpu.vector_store %arg3[%c0_7, %c0_8], %57 {strides = array<i32>} : memref<8x128xf32, #tpu.memory_space<vmem>>, vector<8x128xf32>,
    return
  }
}

</mosaic_0001>

<bundles_post_ra>
// kernel: tpu_custom_call.1
= control target key start
LH: loop header
LB: loop body
LE: loop exit
PB: predicated region body
PF: predicated region fallthrough
CT: control target
= control target key end

     0   :  { %8 = vsyncpa [#allocation3], 0  ;;  %s414_s0 = inlined_call_operand.hbm [shape: s32[8,8], index: 0, kind: input, shape index: {}]   ;;  %s415_s1 = inlined_call_operand.hbm [shape: f32[32,128], index: 1, kind: input, shape index: {}]   ;;  %s416_s2 = inlined_call_operand.vmem [shape: f32[1,128], index: 2, kind: input, shape index: {}]   ;;  %s417_s3 = inlined_call_operand.hbm [shape: f32[8,128], index: 3, kind: output, shape index: {}]  }
   0x1   :  { %9 = vsyncpa [#allocation6], 0 }
   0x2   :  { %10 = vsyncpa [#allocation4], 0  ;;  %s332_s12 = smov [#allocation2]   ;;  %s333_s14 = smov [#allocation5]  }
   0x3   :  { %s17_s13 = sshll.u32 %s332_s12, 4  ;;  %s26_s15 = sshll.u32 %s333_s14, 4  ;;  %s18_s13 = int_to_ptr.vmem [resolvable:$true] %s17_s13  ;;  %s368_s15 = int_to_ptr.vmem [resolvable:$true] %s26_s15 }
   0x4   :  { %s260_s18 = scalar_lea.hbm %s414_s0, 128 }
   0x5   :  { %p261_p0 = scmp.ne.s32.totalorder %s414_s0, %s260_s18  ;;  %p264_p1 = scmp.lt.u32.totalorder %s260_s18, %s414_s0 }
   0x7   :  { %p266_p2 = pnand %p264_p1, %p261_p0 }
   0x9   :  { %269 = shalt.err (!%p266_p2)
}
   0xa   :  { %s270_s23 = scalar_lea.vmem %s18_s13, 128  ;;  %p275_p4 = scmp.lt.s32.totalorder %s18_s13, %s18_s13 }
   0xb   :  { %p271_p3 = scmp.ne.s32.totalorder %s18_s13, %s270_s23  ;;  %p276_p5 = scmp.lt.s32.totalorder %s270_s23, %s270_s23 }
   0xd   :  { %p277_p6 = por %p276_p5, %p275_p4 }
   0xf   :  { %p278_p7 = pnand %p277_p6, %p271_p3 }
  0x11   :  { %281 = shalt.err (!%p278_p7)
}
  0x12   :  { %20 = dma.hbm_to_vmem [thread:$0]  %s414_s0, 128, %s18_s13, [#allocation3]  }
  0x13   :  { %s282_s28 = scalar_lea.hbm %s415_s1, 512 }
  0x14   :  { %p283_p8 = scmp.ne.s32.totalorder %s415_s1, %s282_s28  ;;  %p286_p9 = scmp.lt.u32.totalorder %s282_s28, %s415_s1 }
  0x16   :  { %p288_p10 = pnand %p286_p9, %p283_p8 }
  0x18   :  { %291 = shalt.err (!%p288_p10)
}
  0x19   :  { %s292_s6 = scalar_lea.vmem %s368_s15, 512  ;;  %p297_p12 = scmp.lt.s32.totalorder %s368_s15, %s368_s15 }
  0x1a   :  { %p293_p11 = scmp.ne.s32.totalorder %s368_s15, %s292_s6  ;;  %p298_p13 = scmp.lt.s32.totalorder %s292_s6, %s292_s6 }
  0x1c   :  { %p299_p0 = por %p298_p13, %p297_p12 }
  0x1e   :  { %p300_p1 = pnand %p299_p0, %p293_p11 }
  0x20   :  { %303 = shalt.err (!%p300_p1)
}
  0x21   :  { %s334_s0 = smov 128   ;;  %s335_s7 = smov 8  }
  0x22   :  { %32 = dma.hbm_to_vmem [thread:$0]  %s415_s1, 512, %s368_s15, [#allocation6], %s334_s0, %s334_s0, %s335_s7  }
  0x23   :  { %326 = dma.done.wait [#allocation3], 128  }
  0x24   :  { %327 = vsyncadd [#allocation3], 4294967168 }
  0x25   :  { %328 = dma.done.wait [#allocation6], 512  }
  0x26   :  { %329 = vsyncadd [#allocation6], 4294966784  ;;  %v336_v0 = vmov 2   ;;  %v337_v1 = vmov 0   ;;  %v41_v2 = vld [vmem:[#allocation2] sm:$0xff]  ;;  %v338_v3 = vmov 3   ;;  %v42_v17 = vlaneseq }
  0x27   :  { %253 = vset.pattern.permute.xlu1 %v336_v0  ;;  %251 = vset.pattern.permute.xlu0 %v337_v1  ;;  %v339_v4 = vmov 1   ;;  %v340_v5 = vmov 4   ;;  %v341_v6 = vmov 5   ;;  %v342_v7 = vmov 6   ;;  %v101_v9 = vld [vmem:[#allocation5] sm:$0xff]  ;;  %v102_v10 = vld [vmem:[#allocation5 + $0x8] sm:$0xff] }
  0x28   :  { %59 = vperm.xlu1 %253, %v41_v2   ;;  %45 = vperm.xlu0 %251, %v41_v2   ;;  %v343_v8 = vmov 7   ;;  %v230_v11 = vpack.c.bf16 %v102_v10, %v101_v9  ;;  %v344_v12 = vmov 0.0|0.0   ;;  %v103_v13 = vld [vmem:[#allocation5 + $0x10] sm:$0xff]  ;;  %v104_v14 = vld [vmem:[#allocation5 + $0x18] sm:$0xff]  ;;  %vm345_vm0 = vmmov 0   ;;  %s347_s11 = smov [#allocation7]  }
  0x29   :  { %229 = vmatprep.subr.bf16.mxu0 %v344_v12  ;;  %v233_v15 = vpack.c.bf16 %v104_v14, %v103_v13  ;;  %v346_v16 = vmov 0.0   ;;  %v43_v20 = vand.u32 127, %v42_v17  ;;  %vm112_vm9 = vcmask 261120   ;;  %v211_v43 = vld [vmem:[%s416_s2] ss:$0 sm:$0xff]  ;;  %s193_s12 = sshll.u32 %s347_s11, 4  ;;  %s194_s12 = int_to_ptr.vmem [resolvable:$true] %s193_s12 }
  0x2a   :  { %231 = vmatpush3.bf16.msra.mxu0 %v230_v11  ;;  %226 = vmatprep.mubr.msk.f32.mxu0 %vm345_vm0, %v346_v16  ;;  %s304_s13 = scalar_lea.vmem %s194_s12, 128  ;;  %p309_p3 = scmp.lt.s32.totalorder %s194_s12, %s194_s12 }
  0x2b   :  { %232 = vmatprep.subr.bf16.mxu0 %v344_v12  ;;  %p305_p2 = scmp.ne.s32.totalorder %s194_s12, %s304_s13  ;;  %p310_p4 = scmp.lt.s32.totalorder %s304_s13, %s304_s13 }
  0x2c   :  { %254 = vset.pattern.permute.xlu1 %v338_v3  ;;  %252 = vset.pattern.permute.xlu0 %v339_v4 }
  0x2d   :  { %66 = vperm.xlu1 %254, %v41_v2   ;;  %52 = vperm.xlu0 %252, %v41_v2   ;;  %p311_p5 = por %p310_p4, %p309_p3 }
  0x2e   :  { %234 = vmatpush3.bf16.msra.mxu0 %v233_v15 }
  0x2f   :  { %p312_p6 = pnand %p311_p5, %p305_p2 }
  0x31   :  { %255 = vset.pattern.permute.xlu1 %v340_v5  ;;  %256 = vset.pattern.permute.xlu0 %v341_v6 }
  0x32   :  { %73 = vperm.xlu1 %255, %v41_v2   ;;  %80 = vperm.xlu0 %256, %v41_v2  }
  0x36   :  { %257 = vset.pattern.permute.xlu1 %v342_v7  ;;  %259 = vset.pattern.permute.xlu0 %v343_v8 }
  0x37   :  { %87 = vperm.xlu1 %257, %v41_v2  }
  0x3b   :  { %258 = vset.pattern.permute.xlu1 %v343_v8 }
  0x3c   :  { %94 = vperm.xlu1 %258, %v41_v2  }
  0xa7   :  { %v60_v18 = vpop.permute.xlu1 %59  ;;  %v46_v19 = vpop.permute.xlu0 %45 }
  0xa8   :  { %vm47_vm1 = vcmp.eq.s32.totalorder %v46_v19, %v43_v20  ;;  %vm61_vm2 = vcmp.eq.s32.totalorder %v60_v18, %v43_v20 }
  0xa9   :  { %v203_v23 = vsel %vm47_vm1, 1.0, %v346_v16  ;;  %v205_v26 = vsel %vm61_vm2, 1.0, %v346_v16 }
  0xac   :  { %v67_v21 = vpop.permute.xlu1 %66  ;;  %v53_v22 = vpop.permute.xlu0 %52 }
  0xad   :  { %vm54_vm3 = vcmp.eq.s32.totalorder %v53_v22, %v43_v20  ;;  %vm68_vm4 = vcmp.eq.s32.totalorder %v67_v21, %v43_v20 }
  0xae   :  { %v204_v24 = vsel %vm54_vm3, 1.0, %v346_v16  ;;  %v206_v30 = vsel %vm68_vm4, 1.0, %v346_v16 }
  0xaf   :  { %v57_v25 = vadd.f32 %v204_v24, %v203_v23 }
  0xb1   :  { %v64_v27 = vadd.f32 %v205_v26, %v57_v25  ;;  %v74_v28 = vpop.permute.xlu1 %73  ;;  %v81_v29 = vpop.permute.xlu0 %80 }
  0xb2   :  { %vm75_vm5 = vcmp.eq.s32.totalorder %v74_v28, %v43_v20  ;;  %vm82_vm6 = vcmp.eq.s32.totalorder %v81_v29, %v43_v20 }
  0xb3   :  { %v71_v31 = vadd.f32 %v206_v30, %v64_v27  ;;  %v207_v32 = vsel %vm75_vm5, 1.0, %v346_v16  ;;  %v208_v34 = vsel %vm82_vm6, 1.0, %v346_v16 }
  0xb5   :  { %v78_v33 = vadd.f32 %v207_v32, %v71_v31 }
  0xb6   :  { %v88_v35 = vpop.permute.xlu1 %87 }
  0xb7   :  { %vm89_vm7 = vcmp.eq.s32.totalorder %v88_v35, %v43_v20  ;;  %v85_v36 = vadd.f32 %v208_v34, %v78_v33 }
  0xb8   :  { %v209_v37 = vsel %vm89_vm7, 1.0, %v346_v16 }
  0xb9   :  { %v92_v39 = vadd.f32 %v209_v37, %v85_v36 }
  0xbb   :  { %v95_v38 = vpop.permute.xlu1 %94 }
  0xbc   :  { %vm96_vm8 = vcmp.eq.s32.totalorder %v95_v38, %v43_v20 }
  0xbd   :  { %v210_v40 = vsel %vm96_vm8, 1.0, %v346_v16 }
  0xbe   :  { %v99_v41 = vadd.f32 %v210_v40, %v92_v39 }
  0xc0   :  { %v100_v42 = vmul.f32 0.125, %v99_v41 }
  0xc2   :  { %227 = vmatmul.mubr.msk.f32.vlgmr.msra.gmra.mrb[0].mxu0 %vm112_vm9, %v100_v42 }
 0x195   :  { %v182_v44 = vpop.f32.mrb[0].mxu0 }
 0x196   :  { %v183_v45 = vadd.f32 %v211_v43, %v182_v44  ;;  %v228_v46 = vpop.f32.mrb[1].mxu0 }
 0x198   :  { %186 = vst [vmem:[#allocation7] sm:$0xff] %v183_v45 }
 0x199   :  { %315 = shalt.err (!%p312_p6)
}
 0x19a   :  { %s316_s16 = scalar_lea.hbm %s417_s3, 128 }
 0x19b   :  { %p317_p7 = scmp.ne.s32.totalorder %s417_s3, %s316_s16  ;;  %p320_p8 = scmp.lt.u32.totalorder %s316_s16, %s417_s3 }
 0x19d   :  { %p322_p9 = pnand %p320_p8, %p317_p7 }
 0x19f   :  { %325 = shalt.err (!%p322_p9)
}
 0x1a0   :  { %196 = dma.vmem_to_hbm [thread:$0]  %s194_s12, 128, %s417_s3, [#allocation4]  }
 0x1a1   :  { %330 = dma.done.wait [#allocation4], 128  }
 0x1a2   :  { %331 = vsyncadd [#allocation4], 4294967168 }
 0x1a3   :  { %200 = vsyncpa [#allocation3], 1 }
 0x1a4   :  { %201 = vsyncpa [#allocation6], 1 }
 0x1a5   :  { %202 = vsyncpa [#allocation4], 1 }

</bundles_post_ra>
